<compile_context>
chip_gen: v6e
topology: v6e:2x2x1
jax: 0.10.0
libtpu: 0.0.40
codegen_flags: <defaults>
</compile_context>

<pallas_src>
import jax
import jax.numpy as jnp
from jax.experimental import pallas as pl
from jax.experimental.pallas import tpu as pltpu


def _round_up(x, m):
    return ((x + m - 1) // m) * m


# ----------------------------------------------------------------------------
# Kernels
# ----------------------------------------------------------------------------
def _patch_embed_kernel(x_ref, w_ref, b_ref, o_ref):
    # x_ref : (TILE_M, K_pad)   pre-masked, pre-cast flattened patches
    # w_ref : (K_pad, planes_pad)  VMEM-resident weight
    # b_ref : (1, planes_pad)      f32 bias
    # o_ref : (TILE_M, planes_pad)
    acc = jnp.dot(x_ref[...], w_ref[...], preferred_element_type=jnp.float32)
    o_ref[...] = (acc + b_ref[...]).astype(o_ref.dtype)


def _masked_patch_embed_kernel(x_ref, m_ref, w_ref, b_ref, o_ref):
    # x_ref : (TILE_M, K)        K = C*p*p, (c, ph, pw) order
    # m_ref : (TILE_M, p*p)      compact per-patch mask (channel independent)
    # Per-channel K-slice accumulate: no (TILE_M, K) temporaries, slices are
    # lane-aligned because p*p % 128 == 0 on this path.
    pp = m_ref.shape[1]
    c = x_ref.shape[1] // pp
    m = m_ref[...]
    acc = None
    for ci in range(c):                       # static unroll over channels
        sl = slice(ci * pp, (ci + 1) * pp)
        part = jnp.dot(x_ref[:, sl] * m, w_ref[sl, :],
                       preferred_element_type=jnp.float32)
        acc = part if acc is None else acc + part
    o_ref[...] = (acc + b_ref[...]).astype(o_ref.dtype)


# ----------------------------------------------------------------------------
# Host-side helpers
# ----------------------------------------------------------------------------
def _extract_x_patches(x_nchw, mask_nhw, patch, dtype, k_pad):
    # (N, C, H, W) -> (M, K[_pad]) with (c, ph, pw) minor ordering.
    # If mask_nhw is given, the multiply fuses into the transpose (free).
    n, c, h, w = x_nchw.shape
    nh, nw = h // patch, w // patch
    k = c * patch * patch
    xm = x_nchw if mask_nhw is None else x_nchw * mask_nhw[:, None, :, :]
    xm = xm.astype(dtype).reshape(n, c, nh, patch, nw, patch)
    xm = jnp.transpose(xm, (0, 2, 4, 1, 3, 5))          # (N, nh, nw, C, p, p)
    xm = xm.reshape(n * nh * nw, k)
    if k_pad != k:
        xm = jnp.pad(xm, ((0, 0), (0, k_pad - k)))
    return xm


def _extract_mask_patches(mask_nhw, patch, dtype):
    # (N, H, W) -> (M, p*p); channel-independent compact mask.
    n, h, w = mask_nhw.shape
    nh, nw = h // patch, w // patch
    m = mask_nhw.astype(dtype).reshape(n, nh, patch, nw, patch)
    m = jnp.transpose(m, (0, 1, 3, 2, 4))               # (N, nh, nw, p, p)
    return m.reshape(n * nh * nw, patch * patch)


def _vmem_bytes(tm, k_pad, planes_pad, pp, cdt_bytes, out_bytes, use_mask):
    b = 2 * tm * k_pad * cdt_bytes                      # activation (double buf)
    if use_mask:
        b += 2 * tm * pp * cdt_bytes                    # compact mask
    b += 2 * k_pad * planes_pad * cdt_bytes             # weight
    b += 2 * planes_pad * 4                             # bias
    b += 2 * tm * planes_pad * out_bytes                # output
    return b


def _tm_cap_from_vmem(budget, k_pad, planes_pad, pp, cdt_bytes, out_bytes,
                      use_mask, sub):
    fixed = 2 * k_pad * planes_pad * cdt_bytes + 2 * planes_pad * 4 + (1 << 20)
    per_row = 2 * (k_pad * cdt_bytes
                   + (pp * cdt_bytes if use_mask else 0)
                   + planes_pad * out_bytes)
    avail = max(budget - fixed, per_row * sub)
    return max(sub, (avail // per_row) // sub * sub)


def _choose_tile_m(m_tokens, tile_m, tm_cap, sub):
    # Prefer a tile that divides M exactly (no full-activation pad), is a
    # multiple of the sublane granule, and fits the VMEM budget.
    cap = max(sub, min(tile_m, tm_cap, _round_up(m_tokens, sub)))
    best = 0
    t = sub
    while t <= min(cap, m_tokens):
        if m_tokens % t == 0:
            best = t
        t += sub
    if best:
        return best, m_tokens
    if m_tokens <= cap:                                  # tiny M: single tile
        m_pad = _round_up(m_tokens, sub)
        return m_pad, m_pad
    tm = (cap // sub) * sub                              # ragged fallback: pad
    return tm, _round_up(m_tokens, tm)


# ----------------------------------------------------------------------------
# Public wrapper
# ----------------------------------------------------------------------------
def patch_embedding_block(x, mask, weight, bias, patch, *,
                          compute_dtype=jnp.bfloat16, out_dtype=None,
                          out_layout="NCHW", tile_m=1024,
                          vmem_budget_bytes=48 * 1024 * 1024,
                          fuse_mask_on_host=None):
    """x: (N, C, H, W); mask broadcastable to (N, 1, H, W) (channel-indep.);
    weight: (planes, C, p, p) PyTorch OIHW layout; bias: (planes,).
    out_layout: "NCHW" (nn.Conv2d-compatible) or "NLC" = (N, nh*nw, planes)
    which skips the final transpose."""
    n, c, h, w = x.shape
    planes = weight.shape[0]
    nh, nw = h // patch, w // patch
    pp = patch * patch
    k = c * pp
    m_tokens = n * nh * nw

    cdt = jnp.dtype(compute_dtype)
    odt = jnp.dtype(out_dtype) if out_dtype is not None else jnp.dtype(x.dtype)
    cdt_bytes, out_bytes = cdt.itemsize, odt.itemsize
    sub = 16 if cdt_bytes < 4 else 8                    # sublane granule

    planes_pad = _round_up(planes, 128)                 # lane-dense output

    # Mask: squeeze to (N, H, W). Per-channel masks not supported by the
    # compact/fused paths (MAE masks are (N, 1, H, W)).
    m = jnp.asarray(mask)
    if m.ndim == 4:
        assert m.shape[1] == 1, "per-channel mask not supported"
        m = m[:, 0]
    m = jnp.broadcast_to(m, (n, h, w))

    if fuse_mask_on_host is None:
        # Small patches -> fuse mask on host; lane-aligned patches -> in-kernel
        # compact mask (C x less mask HBM traffic).
        fuse_mask_on_host = (pp % 128 != 0)
    use_mask_in_kernel = not fuse_mask_on_host
    if use_mask_in_kernel:
        assert pp % 128 == 0, "in-kernel mask path needs p*p % 128 == 0"

    k_pad = k if use_mask_in_kernel else _round_up(k, 128)

    tm_cap = _tm_cap_from_vmem(vmem_budget_bytes, k_pad, planes_pad, pp,
                               cdt_bytes, out_bytes, use_mask_in_kernel, sub)
    tm, m_pad = _choose_tile_m(m_tokens, tile_m, tm_cap, sub)

    xp = _extract_x_patches(x, m if fuse_mask_on_host else None,
                            patch, cdt, k_pad)
    if m_pad != m_tokens:
        xp = jnp.pad(xp, ((0, m_pad - m_tokens), (0, 0)))

    operands = [xp]
    in_specs = [pl.BlockSpec((tm, k_pad), lambda i: (i, 0))]

    if use_mask_in_kernel:
        mp = _extract_mask_patches(m, patch, cdt)
        if m_pad != m_tokens:
            mp = jnp.pad(mp, ((0, m_pad - m_tokens), (0, 0)))
        operands.append(mp)
        in_specs.append(pl.BlockSpec((tm, pp), lambda i: (i, 0)))

    w_mat = jnp.transpose(weight.reshape(planes, k)).astype(cdt)   # (K, planes)
    w_mat = jnp.pad(w_mat, ((0, k_pad - k), (0, planes_pad - planes)))
    b_mat = jnp.pad(bias.astype(jnp.float32),
                    (0, planes_pad - planes)).reshape(1, planes_pad)
    operands += [w_mat, b_mat]
    in_specs += [pl.BlockSpec((k_pad, planes_pad), lambda i: (0, 0)),
                 pl.BlockSpec((1, planes_pad), lambda i: (0, 0))]

    needed = _vmem_bytes(tm, k_pad, planes_pad, pp, cdt_bytes, out_bytes,
                         use_mask_in_kernel)
    vmem_limit = int(min(max(needed + (4 << 20), 16 << 20), 64 << 20))

    cost = pl.CostEstimate(
        flops=2 * m_pad * k_pad * planes_pad,
        transcendentals=0,
        bytes_accessed=(m_pad * k_pad
                        + (m_pad * pp if use_mask_in_kernel else 0)
                        + k_pad * planes_pad) * cdt_bytes
                       + planes_pad * 4
                       + m_pad * planes_pad * out_bytes)

    kernel = _masked_patch_embed_kernel if use_mask_in_kernel else _patch_embed_kernel

    out = pl.pallas_call(
        kernel,
        out_shape=jax.ShapeDtypeStruct((m_pad, planes_pad), odt),
        grid=(m_pad // tm,),
        in_specs=in_specs,
        out_specs=pl.BlockSpec((tm, planes_pad), lambda i: (i, 0)),
        compiler_params=pltpu.CompilerParams(
            dimension_semantics=("parallel",),
            vmem_limit_bytes=vmem_limit),
        cost_estimate=cost,
    )(*operands)

    out = out[:m_tokens, :planes]                        # drop pad rows / cols
    if out_layout == "NLC":
        return out.reshape(n, nh * nw, planes)           # free reshape, no HBM pass
    out = out.reshape(n, nh, nw, planes)
    return jnp.transpose(out, (0, 3, 1, 2))              # NCHW, as nn.Conv2d


# TODO(synk): has_norm=True branch (GroupNorm(1, inplanes) after conv) is not
# implemented; upstream it only type-checks when inplanes == planes.


# ----------------------------------------------------------------------------
# Self-test
# ----------------------------------------------------------------------------
if __name__ == "__main__":
    key = jax.random.PRNGKey(0)
    k_x, k_m, k_w, k_b, k_x2, k_m2, k_w2, k_b2 = jax.random.split(key, 8)

    def conv_ref(x, mask, weight, bias, patch):
        xm = x * mask
        planes = weight.shape[0]
        return jax.lax.conv_general_dilated(
            xm, weight, window_strides=(patch, patch), padding="VALID",
            dimension_numbers=("NCHW", "OIHW", "NCHW")) + bias.reshape(1, planes, 1, 1)

    # --- Config 1: small patch (host-fused mask path), batch=2, C=4, 16x16 ---
    N, C, H, W, patch, planes = 2, 4, 16, 16, 4, 32
    x = jax.random.normal(k_x, (N, C, H, W), dtype=jnp.float32)
    mask = jax.random.bernoulli(k_m, 0.75, (N, 1, H, W)).astype(jnp.float32)
    weight = jax.random.normal(k_w, (planes, C, patch, patch), jnp.float32) * 0.05
    bias = jax.random.normal(k_b, (planes,), jnp.float32) * 0.01
    ref = conv_ref(x, mask, weight, bias, patch)

    # Default path: bf16 MXU compute, f32 accumulate.
    out = jax.block_until_ready(patch_embedding_block(x, mask, weight, bias, patch))
    assert out.shape == (N, planes, H // patch, W // patch)
    assert jnp.allclose(out, ref, atol=5e-2, rtol=5e-2)

    # f32 compute path: near-exact.
    out_f32 = jax.block_until_ready(
        patch_embedding_block(x, mask, weight, bias, patch,
                              compute_dtype=jnp.float32))
    assert jnp.allclose(out_f32, ref, atol=1e-4, rtol=1e-4)

    # NLC output layout (skips the NCHW transpose).
    out_nlc = jax.block_until_ready(
        patch_embedding_block(x, mask, weight, bias, patch, out_layout="NLC"))
    ref_nlc = jnp.transpose(ref, (0, 2, 3, 1)).reshape(N, -1, planes)
    assert out_nlc.shape == ref_nlc.shape
    assert jnp.allclose(out_nlc, ref_nlc, atol=5e-2, rtol=5e-2)

    # --- Config 2: lane-aligned patch (in-kernel compact-mask path), p=16 ---
    N2, C2, H2, W2, patch2, planes2 = 2, 4, 32, 32, 16, 32
    x2 = jax.random.normal(k_x2, (N2, C2, H2, W2), dtype=jnp.float32)
    mask2 = jax.random.bernoulli(k_m2, 0.75, (N2, 1, H2, W2)).astype(jnp.float32)
    weight2 = jax.random.normal(k_w2, (planes2, C2, patch2, patch2), jnp.float32) * 0.02
    bias2 = jax.random.normal(k_b2, (planes2,), jnp.float32) * 0.01
    ref2 = conv_ref(x2, mask2, weight2, bias2, patch2)

    out2 = jax.block_until_ready(
        patch_embedding_block(x2, mask2, weight2, bias2, patch2))   # bf16, in-kernel mask
    assert out2.shape == (N2, planes2, H2 // patch2, W2 // patch2)
    assert jnp.allclose(out2, ref2, atol=5e-2, rtol=5e-2)

    out2_f32 = jax.block_until_ready(
        patch_embedding_block(x2, mask2, weight2, bias2, patch2,
                              compute_dtype=jnp.float32))
    assert jnp.allclose(out2_f32, ref2, atol=1e-3, rtol=1e-3)

    print("KERNEL_OK")
</pallas_src>

<mosaic_0001>
module attributes {stable_mosaic.version = 11 : i64} {
  func.func @_patch_embed_kernel(%arg0: i32, %arg1: memref<32x128xbf16, #tpu.memory_space<vmem>>, %arg2: memref<128x128xbf16, #tpu.memory_space<vmem>>, %arg3: memref<1x128xf32, #tpu.memory_space<vmem>>, %arg4: memref<32x128xf32, #tpu.memory_space<vmem>>) attributes {dimension_semantics = [#tpu.dimension_semantics<parallel>], iteration_bounds = array<i64: 1>, scalar_prefetch = 0 : i64, scratch_operands = 0 : i64, tpu.core_type = #tpu.core_type<tc>, window_params = [{transform_indices = @transform_0, window_bounds = array<i64: 32, 128>}, {pipeline_mode = #tpu.pipeline_mode<synchronous>, transform_indices = @transform_1, window_bounds = array<i64: 128, 128>}, {pipeline_mode = #tpu.pipeline_mode<synchronous>, transform_indices = @transform_2, window_bounds = array<i64: 1, 128>}, {transform_indices = @transform_3, window_bounds = array<i64: 32, 128>}]} {
    %c0 = arith.constant 0 : index
    %c0_0 = arith.constant 0 : index
    %0 = vector.load %arg1[%c0, %c0_0] : memref<32x128xbf16, #tpu.memory_space<vmem>>, vector<32x128xbf16>
    %c0_1 = arith.constant 0 : index
    %c0_2 = arith.constant 0 : index
    %1 = vector.load %arg2[%c0_1, %c0_2] : memref<128x128xbf16, #tpu.memory_space<vmem>>, vector<128x128xbf16>
    %cst = arith.constant dense<0.000000e+00> : vector<32x128xf32>
    %2 = tpu.matmul %0, %1, %cst {dimension_numbers = #tpu.dot_dimension_numbers<[1], [0], [0], [1], [0, 0, 1, 1], [], []>} : vector<32x128xbf16>, vector<128x128xbf16>, vector<32x128xf32> -> vector<32x128xf32>
    %c0_3 = arith.constant 0 : index
    %c0_4 = arith.constant 0 : index
    %3 = vector.load %arg3[%c0_3, %c0_4] : memref<1x128xf32, #tpu.memory_space<vmem>>, vector<1x128xf32>
    %4 = vector.broadcast %3 : vector<1x128xf32> to vector<32x128xf32>
    %5 = arith.addf %2, %4 : vector<32x128xf32>
    %c0_5 = arith.constant 0 : index
    %c0_6 = arith.constant 0 : index
    %6 = vector.load %arg4[%c0_5, %c0_6] : memref<32x128xf32, #tpu.memory_space<vmem>>, vector<32x128xf32>
    tpu.vector_store %arg4[%c0_5, %c0_6], %5 {strides = array<i32>} : memref<32x128xf32, #tpu.memory_space<vmem>>, vector<32x128xf32>,
    return
  }
  func.func @transform_0(%arg0: i32) -> (i32, i32) {
    %c0_i32 = arith.constant 0 : i32
    %c0_i32_0 = arith.constant 0 : i32
    return %arg0, %c0_i32 : i32, i32
  }
  func.func @transform_1(%arg0: i32) -> (i32, i32) {
    %c0_i32 = arith.constant 0 : i32
    %c0_i32_0 = arith.constant 0 : i32
    %c0_i32_1 = arith.constant 0 : i32
    return %c0_i32, %c0_i32_0 : i32, i32
  }
  func.func @transform_2(%arg0: i32) -> (i32, i32) {
    %c0_i32 = arith.constant 0 : i32
    %c0_i32_0 = arith.constant 0 : i32
    %c0_i32_1 = arith.constant 0 : i32
    return %c0_i32, %c0_i32_0 : i32, i32
  }
  func.func @transform_3(%arg0: i32) -> (i32, i32) {
    %c0_i32 = arith.constant 0 : i32
    %c0_i32_0 = arith.constant 0 : i32
    return %arg0, %c0_i32 : i32, i32
  }
}

</mosaic_0001>

<bundles_post_ra>
// kernel: tpu_custom_call.1
= control target key start
LH: loop header
LB: loop body
LE: loop exit
PB: predicated region body
PF: predicated region fallthrough
CT: control target
= control target key end

     0   :  { %8 = vsyncpa [#allocation3], 0  ;;  %s365_s0 = inlined_call_operand.hbm [shape: bf16[32,128], index: 0, kind: input, shape index: {}]   ;;  %s366_s1 = inlined_call_operand.hbm [shape: bf16[128,128], index: 1, kind: input, shape index: {}]   ;;  %s367_s2 = inlined_call_operand.vmem [shape: f32[1,128], index: 2, kind: input, shape index: {}]   ;;  %s368_s3 = inlined_call_operand.hbm [shape: f32[32,128], index: 3, kind: output, shape index: {}]  }
   0x1   :  { %9 = vsyncpa [#allocation6], 0 }
   0x2   :  { %10 = vsyncpa [#allocation4], 0  ;;  %s326_s12 = smov [#allocation2]  }
   0x3   :  { %s16_s13 = sshll.u32 %s326_s12, 4  ;;  %s17_s13 = int_to_ptr.vmem [resolvable:$true] %s16_s13 }
   0x4   :  { %s268_s14 = scalar_lea.vmem %s17_s13, 256  ;;  %p273_p1 = scmp.lt.s32.totalorder %s17_s13, %s17_s13 }
   0x5   :  { %p269_p0 = scmp.ne.s32.totalorder %s17_s13, %s268_s14  ;;  %p274_p2 = scmp.lt.s32.totalorder %s268_s14, %s268_s14 }
   0x7   :  { %p275_p3 = por %p274_p2, %p273_p1 }
   0x9   :  { %p276_p4 = pnand %p275_p3, %p269_p0 }
   0xb   :  { %279 = shalt.err (!%p276_p4)
}
   0xc   :  { %s327_s15 = smov 64   ;;  %s328_s16 = smov 4  }
   0xd   :  { %22 = dma.hbm_to_vmem [thread:$0]  %s365_s0, 256, %s17_s13, [#allocation3], %s327_s15, %s327_s15, %s328_s16  }
   0xe   :  { %s329_s19 = smov [#allocation5]  }
   0xf   :  { %s28_s20 = sshll.u32 %s329_s19, 4  ;;  %s29_s20 = int_to_ptr.vmem [resolvable:$true] %s28_s20 }
  0x10   :  { %s288_s21 = scalar_lea.vmem %s29_s20, 1024  ;;  %p293_p6 = scmp.lt.s32.totalorder %s29_s20, %s29_s20 }
  0x11   :  { %p289_p5 = scmp.ne.s32.totalorder %s29_s20, %s288_s21  ;;  %p294_p7 = scmp.lt.s32.totalorder %s288_s21, %s288_s21 }
  0x13   :  { %p295_p8 = por %p294_p7, %p293_p6 }
  0x15   :  { %p296_p9 = pnand %p295_p8, %p289_p5 }
  0x17   :  { %299 = shalt.err (!%p296_p9)
}
  0x18   :  { %34 = dma.hbm_to_vmem [thread:$0]  %s366_s1, 1024, %s29_s20, [#allocation6], %s327_s15, %s327_s15, %s328_s16  }
  0x19   :  { %320 = dma.done.wait [#allocation3], 256  }
  0x1a   :  { %321 = vsyncadd [#allocation3], 4294967040 }
  0x1b   :  { %322 = dma.done.wait [#allocation6], 1024  }
  0x1c   :  { %323 = vsyncadd [#allocation6], 4294966272  ;;  %v250_v0 = vld [vmem:[#allocation5 + $0x38] sm:$0xff]   ;;  %v251_v1 = vld [vmem:[#allocation5 + $0x30] sm:$0xff]   ;;  %s330_s24 = smov [#allocation7]  }
  0x1d   :  { %223 = vmatprep.subr.bf16.mxu0 %v250_v0  ;;  %v252_v2 = vld [vmem:[#allocation5 + $0x28] sm:$0xff]   ;;  %v253_v3 = vld [vmem:[#allocation5 + $0x20] sm:$0xff]   ;;  %v258_v4 = vld [vmem:[#allocation2] sm:$0xff]   ;;  %s189_s25 = sshll.u32 %s330_s24, 4  ;;  %s190_s25 = int_to_ptr.vmem [resolvable:$true] %s189_s25 }
  0x1e   :  { %224 = vmatpush3.bf16.msra.mxu0 %v250_v0  ;;  %239 = vmatprep.mubr.bf16.mxu0 %v258_v4  ;;  %v254_v5 = vld [vmem:[#allocation5 + $0x18] sm:$0xff]   ;;  %v255_v6 = vld [vmem:[#allocation5 + $0x10] sm:$0xff]   ;;  %v256_v7 = vld [vmem:[#allocation5 + $0x8] sm:$0xff]   ;;  %s300_s26 = scalar_lea.vmem %s190_s25, 512  ;;  %p305_p11 = scmp.lt.s32.totalorder %s190_s25, %s190_s25 }
  0x1f   :  { %225 = vmatprep.subr.bf16.mxu0 %v251_v1  ;;  %v257_v8 = vld [vmem:[#allocation5] sm:$0xff]   ;;  %v259_v9 = vld [vmem:[#allocation2 + $0x8] sm:$0xff]   ;;  %v202_v10 = vld [vmem:[%s367_s2] ss:$0 sm:$0xff]  ;;  %p301_p10 = scmp.ne.s32.totalorder %s190_s25, %s300_s26  ;;  %p306_p12 = scmp.lt.s32.totalorder %s300_s26, %s300_s26 }
  0x21   :  { %p307_p13 = por %p306_p12, %p305_p11 }
  0x22   :  { %226 = vmatpush3.bf16.msra.mxu0 %v251_v1 }
  0x23   :  { %227 = vmatprep.subr.bf16.mxu0 %v252_v2  ;;  %p308_p0 = pnand %p307_p13, %p301_p10 }
  0x26   :  { %228 = vmatpush3.bf16.msra.mxu0 %v252_v2 }
  0x27   :  { %229 = vmatprep.subr.bf16.mxu0 %v253_v3 }
  0x2a   :  { %230 = vmatpush3.bf16.msra.mxu0 %v253_v3 }
  0x2b   :  { %231 = vmatprep.subr.bf16.mxu0 %v254_v5 }
  0x2e   :  { %232 = vmatpush3.bf16.msra.mxu0 %v254_v5 }
  0x2f   :  { %233 = vmatprep.subr.bf16.mxu0 %v255_v6 }
  0x32   :  { %234 = vmatpush3.bf16.msra.mxu0 %v255_v6 }
  0x33   :  { %235 = vmatprep.subr.bf16.mxu0 %v256_v7 }
  0x36   :  { %236 = vmatpush3.bf16.msra.mxu0 %v256_v7 }
  0x37   :  { %237 = vmatprep.subr.bf16.mxu0 %v257_v8 }
  0x3a   :  { %238 = vmatpush3.bf16.msra.mxu0 %v257_v8 }
  0x3d   :  { %240 = vmatmul.mubr.bf16.vlgmr.msra.gmra.mxu0 %v259_v9 }
  0xfd   :  { %v241_v11 = vpop.f32.mrf.mxu0 }
  0xfe   :  { %v174_v12 = vadd.f32 %v241_v11, %v202_v10 }
  0xff   :  { %v165_v13 = vpop.f32.mrf.mxu0 }
 0x100   :  { %182 = vst [vmem:[#allocation7 + $0x10] sm:$0xff] %v174_v12  ;;  %v166_v14 = vadd.f32 %v202_v10, %v165_v13 }
 0x101   :  { %v242_v15 = vpop.f32.mrf.mxu0 }
 0x102   :  { %180 = vst [vmem:[#allocation7] sm:$0xff] %v166_v14  ;;  %v177_v16 = vadd.f32 %v242_v15, %v202_v10 }
 0x103   :  { %v168_v17 = vpop.f32.mrf.mxu0 }
 0x104   :  { %183 = vst [vmem:[#allocation7 + $0x18] sm:$0xff] %v177_v16  ;;  %v169_v18 = vadd.f32 %v202_v10, %v168_v17 }
 0x106   :  { %181 = vst [vmem:[#allocation7 + $0x8] sm:$0xff] %v169_v18 }
 0x107   :  { %311 = shalt.err (!%p308_p0)
}
 0x108   :  { %s331_s2 = smov 128   ;;  %s332_s27 = smov 8  }
 0x109   :  { %195 = dma.vmem_to_hbm [thread:$0]  %s190_s25, 512, %s368_s3, [#allocation4], %s331_s2, %s331_s2, %s332_s27  }
 0x10a   :  { %324 = dma.done.wait [#allocation4], 512  }
 0x10b   :  { %325 = vsyncadd [#allocation4], 4294966784 }
 0x10c   :  { %199 = vsyncpa [#allocation3], 1 }
 0x10d   :  { %200 = vsyncpa [#allocation6], 1 }
 0x10e   :  { %201 = vsyncpa [#allocation4], 1 }

</bundles_post_ra>
